<compile_context>
chip_gen: v7x
topology: tpu7x:2x2x1
jax: 0.10.0
libtpu: 0.0.40
codegen_flags: <defaults>
</compile_context>

<pallas_src>
import functools

import jax
import jax.numpy as jnp
from jax import lax
from jax.experimental import pallas as pl
from jax.experimental.pallas import tpu as pltpu

_LANES = 128


def _dice_kernel(n_ref, x_ref, t_ref, out_ref, *,
                 n_inner, block_elems, needs_mask):
    o = pl.program_id(0)   # parallel (per-core) axis
    s = pl.program_id(1)   # arbitrary (streaming) axis

    @pl.when(s == 0)
    def _init():
        out_ref[...] = jnp.zeros_like(out_ref)

    rows, lanes = x_ref.shape           # static block shape; rows % 8 == 0
    x = x_ref[...].astype(jnp.float32)  # compute in f32 (v5e has no bf16 VPU/EUP)
    t = t_ref[...].astype(jnp.float32)
    # Single-EUP-push sigmoid (one tanh instead of exp + reciprocal).
    p = 0.5 * jnp.tanh(0.5 * x) + 0.5

    def _accumulate(p_blk, t_blk):
        prod = p_blk * t_blk
        # Fold the block to one (8, 128) vreg tile with pure VPU adds; the
        # single cross-lane reduction happens outside the kernel in XLA.
        out_ref[0, 0, :, :] += jnp.sum(prod.reshape(rows // 8, 8, lanes), axis=0)
        out_ref[0, 1, :, :] += jnp.sum(p_blk.reshape(rows // 8, 8, lanes), axis=0)
        out_ref[0, 2, :, :] += jnp.sum(t_blk.reshape(rows // 8, 8, lanes), axis=0)

    if needs_mask:
        # Unclamped linear block index (the index_map clamps the DMA source;
        # the mask below zeroes duplicated / out-of-range contributions).
        b = o * n_inner + s
        is_tail = (b + 1) * block_elems > n_ref[0]

        @pl.when(jnp.logical_not(is_tail))
        def _hot():
            _accumulate(p, t)

        @pl.when(is_tail)
        def _tail():
            rem = n_ref[0] - b * block_elems
            idx = (lax.broadcasted_iota(jnp.int32, (rows, lanes), 0) * lanes
                   + lax.broadcasted_iota(jnp.int32, (rows, lanes), 1))
            valid = idx < rem
            # Mask BEFORE forming the product so garbage (possibly NaN/Inf)
            # VMEM past the valid region cannot leak into any accumulator.
            _accumulate(jnp.where(valid, p, 0.0), jnp.where(valid, t, 0.0))
    else:
        _accumulate(p, t)


def _tpu_tuning():
    """(max_block_rows, n_outer, vmem_limit_bytes) per TPU generation."""
    kind = ""
    try:
        kind = jax.devices()[0].device_kind.lower()
    except Exception:  # pragma: no cover - defensive; use conservative defaults
        pass
    if "v7" in kind:
        # 4 MiB/input/buffer; split the stream across both TensorCores.
        return 8192, 2, 40 * 1024 * 1024
    if "v6" in kind:
        return 8192, 1, 48 * 1024 * 1024
    if "v5 lite" in kind or "v5lite" in kind or "v5e" in kind:
        # v5e scoped-VMEM default is only 16 MiB; 2 MiB/input/buffer is plenty.
        return 4096, 1, 24 * 1024 * 1024
    return 4096, 1, 32 * 1024 * 1024


def dice_loss(inputs, targets, smooth=1.0):
    """Pallas equivalent of DiceLoss.forward."""
    x = jnp.ravel(inputs)    # free reshape; keep native dtype (no upcast copy)
    t = jnp.ravel(targets)
    n = x.shape[0]

    # Sublane alignment for a non-full block: 8 rows for 4-byte dtypes,
    # 16 for 2-byte, 32 for 1-byte.  Use the strictest of the two inputs.
    min_itemsize = min(jnp.dtype(x.dtype).itemsize, jnp.dtype(t.dtype).itemsize)
    align = max(8, 32 // max(min_itemsize, 1))
    chunk = align * _LANES
    n_pad = pl.cdiv(n, chunk) * chunk
    if n_pad != n:
        # TODO(synk): rare fallback (numel not a multiple of align*128) pays one
        # HBM pad copy; typical segmentation shapes take the copy-free path.
        x = jnp.pad(x, (0, n_pad - n))
        t = jnp.pad(t, (0, n_pad - n))

    rows = n_pad // _LANES                   # multiple of `align` (>= 8)
    x2 = x.reshape(rows, _LANES)
    t2 = t.reshape(rows, _LANES)

    max_block_rows, n_outer_target, vmem_limit = _tpu_tuning()
    block_rows = min(max_block_rows, rows)   # multiple of `align`, <= rows
    num_blocks = pl.cdiv(rows, block_rows)
    n_outer = max(1, min(n_outer_target, num_blocks))
    n_inner = pl.cdiv(num_blocks, n_outer)
    block_elems = block_rows * _LANES
    # Mask needed iff the grid covers more elements than are actually valid
    # (padding, partial trailing block, or duplicated overflow blocks).
    needs_mask = (n_outer * n_inner * block_elems) != n

    max_itemsize = max(jnp.dtype(x.dtype).itemsize, jnp.dtype(t.dtype).itemsize)
    # 2 inputs x double-buffer + headroom; never below the per-gen table value.
    vmem_limit = int(max(vmem_limit,
                         4 * block_rows * _LANES * max_itemsize + (4 << 20)))

    def _in_map(o, s, n_s):
        # Clamp so overflow grid steps re-read the last block (their
        # contribution is zeroed by the in-kernel mask).
        return (jnp.minimum(o * n_inner + s, num_blocks - 1), 0)

    kernel = functools.partial(
        _dice_kernel, n_inner=n_inner, block_elems=block_elems,
        needs_mask=needs_mask)
    n_arr = jnp.array([n], dtype=jnp.int32)

    partials = pl.pallas_call(
        kernel,
        out_shape=jax.ShapeDtypeStruct((n_outer, 3, 8, _LANES), jnp.float32),
        grid_spec=pltpu.PrefetchScalarGridSpec(
            num_scalar_prefetch=1,
            grid=(n_outer, n_inner),
            in_specs=[
                pl.BlockSpec((block_rows, _LANES), _in_map),
                pl.BlockSpec((block_rows, _LANES), _in_map),
            ],
            out_specs=pl.BlockSpec((1, 3, 8, _LANES),
                                   lambda o, s, n_s: (o, 0, 0, 0)),
        ),
        compiler_params=pltpu.CompilerParams(
            dimension_semantics=("parallel", "arbitrary"),
            vmem_limit_bytes=vmem_limit,
        ),
    )(n_arr, x2, t2)

    # Tiny final reduction + dice formula in plain JAX (outside the kernel).
    sums = jnp.sum(partials, axis=(0, 2, 3))   # [intersection, sum(p), sum(t)]
    smooth = jnp.float32(smooth)
    dice = (2.0 * sums[0] + smooth) / (sums[1] + sums[2] + smooth)
    return 1.0 - dice


def _dice_loss_ref(inputs, targets, smooth=1.0):
    p = jax.nn.sigmoid(inputs.astype(jnp.float32)).reshape(-1)
    t = targets.astype(jnp.float32).reshape(-1)
    inter = jnp.sum(p * t)
    dice = (2.0 * inter + smooth) / (jnp.sum(p) + jnp.sum(t) + smooth)
    return 1.0 - dice


if __name__ == "__main__":
    key = jax.random.PRNGKey(0)
    k1, k2, k3, k4 = jax.random.split(key, 4)

    # Main check: module-consistent NCHW logits + binary targets.
    B, C, H, W = 2, 4, 16, 16
    inputs = jax.random.normal(k1, (B, C, H, W), dtype=jnp.float32)
    targets = (jax.random.uniform(k2, (B, C, H, W)) > 0.5).astype(jnp.float32)

    loss = dice_loss(inputs, targets)
    jax.block_until_ready(loss)
    ref = _dice_loss_ref(inputs, targets)
    assert jnp.allclose(loss, ref, atol=1e-5, rtol=1e-5), (loss, ref)

    # Secondary check: odd numel exercises the in-kernel tail-mask path.
    inputs2 = jax.random.normal(k3, (2, 3, 15, 9), dtype=jnp.float32)
    targets2 = (jax.random.uniform(k4, (2, 3, 15, 9)) > 0.5).astype(jnp.float32)
    loss2 = dice_loss(inputs2, targets2)
    jax.block_until_ready(loss2)
    ref2 = _dice_loss_ref(inputs2, targets2)
    assert jnp.allclose(loss2, ref2, atol=1e-5, rtol=1e-5), (loss2, ref2)

    print("KERNEL_OK")
</pallas_src>

<mosaic_0001>
module attributes {stable_mosaic.version = 11 : i64} {
  func.func @_dice_kernel(%arg0: i32, %arg1: i32, %arg2: memref<1xi32, #tpu.memory_space<smem>>, %arg3: memref<16x128xf32, #tpu.memory_space<vmem>>, %arg4: memref<16x128xf32, #tpu.memory_space<vmem>>, %arg5: memref<1x3x8x128xf32, #tpu.memory_space<vmem>>) attributes {dimension_semantics = [#tpu.dimension_semantics<parallel>, #tpu.dimension_semantics<arbitrary>], iteration_bounds = array<i64: 1, 1>, scalar_prefetch = 1 : i64, scratch_operands = 0 : i64, tpu.core_type = #tpu.core_type<tc>, window_params = [{transform_indices = @transform_0, window_bounds = array<i64: 16, 128>}, {transform_indices = @transform_1, window_bounds = array<i64: 16, 128>}, {transform_indices = @transform_2, window_bounds = array<i64: 1, 3, 8, 128>}]} {
    %c0_i32 = arith.constant 0 : i32
    %0 = arith.cmpi eq, %arg1, %c0_i32 : i32
    %1 = arith.extui %0 : i1 to i32
    %c0_i32_0 = arith.constant 0 : i32
    %2 = arith.cmpi ne, %1, %c0_i32_0 : i32
    scf.if %2 {
      %cst_31 = arith.constant 0.000000e+00 : f32
      %37 = vector.broadcast %cst_31 : f32 to vector<1x3x8x128xf32>
      %c0_32 = arith.constant 0 : index
      %c0_33 = arith.constant 0 : index
      %c0_34 = arith.constant 0 : index
      %c0_35 = arith.constant 0 : index
      %38 = vector.load %arg5[%c0_32, %c0_33, %c0_34, %c0_35] : memref<1x3x8x128xf32, #tpu.memory_space<vmem>>, vector<1x3x8x128xf32>
      tpu.vector_store %arg5[%c0_32, %c0_33, %c0_34, %c0_35], %37 {strides = array<i32>} : memref<1x3x8x128xf32, #tpu.memory_space<vmem>>, vector<1x3x8x128xf32>,
    } else {
    }
    %c0 = arith.constant 0 : index
    %c0_1 = arith.constant 0 : index
    %3 = vector.load %arg3[%c0, %c0_1] : memref<16x128xf32, #tpu.memory_space<vmem>>, vector<16x128xf32>
    %c0_2 = arith.constant 0 : index
    %c0_3 = arith.constant 0 : index
    %4 = vector.load %arg4[%c0_2, %c0_3] : memref<16x128xf32, #tpu.memory_space<vmem>>, vector<16x128xf32>
    %cst = arith.constant 5.000000e-01 : f32
    %5 = vector.broadcast %cst : f32 to vector<16x128xf32>
    %6 = arith.mulf %5, %3 : vector<16x128xf32>
    %7 = math.tanh %6 : vector<16x128xf32>
    %cst_4 = arith.constant 5.000000e-01 : f32
    %8 = vector.broadcast %cst_4 : f32 to vector<16x128xf32>
    %9 = arith.mulf %8, %7 : vector<16x128xf32>
    %cst_5 = arith.constant 5.000000e-01 : f32
    %10 = vector.broadcast %cst_5 : f32 to vector<16x128xf32>
    %11 = arith.addf %9, %10 : vector<16x128xf32>
    %12 = arith.mulf %11, %4 : vector<16x128xf32>
    %c0_6 = arith.constant 0 : index
    %c0_7 = arith.constant 0 : index
    %c0_8 = arith.constant 0 : index
    %c0_9 = arith.constant 0 : index
    %13 = vector.load %arg5[%c0_6, %c0_7, %c0_8, %c0_9] : memref<1x3x8x128xf32, #tpu.memory_space<vmem>>, vector<1x1x8x128xf32>
    %14 = vector.shape_cast %13 : vector<1x1x8x128xf32> to vector<8x128xf32>
    %15 = vector.shape_cast %12 : vector<16x128xf32> to vector<2x8x128xf32>
    %cst_10 = arith.constant dense<0.000000e+00> : vector<8x128xf32>
    %16 = vector.multi_reduction <add>, %15, %cst_10 [0] : vector<2x8x128xf32> to vector<8x128xf32>
    %17 = arith.addf %14, %16 : vector<8x128xf32>
    %c0_11 = arith.constant 0 : index
    %c0_12 = arith.constant 0 : index
    %c0_13 = arith.constant 0 : index
    %c0_14 = arith.constant 0 : index
    %18 = vector.load %arg5[%c0_11, %c0_12, %c0_13, %c0_14] : memref<1x3x8x128xf32, #tpu.memory_space<vmem>>, vector<1x1x8x128xf32>
    %19 = vector.shape_cast %18 : vector<1x1x8x128xf32> to vector<8x128xf32>
    %20 = vector.shape_cast %17 : vector<8x128xf32> to vector<1x1x8x128xf32>
    tpu.vector_store %arg5[%c0_11, %c0_12, %c0_13, %c0_14], %20 {strides = array<i32>} : memref<1x3x8x128xf32, #tpu.memory_space<vmem>>, vector<1x1x8x128xf32>,
    %c0_15 = arith.constant 0 : index
    %c1 = arith.constant 1 : index
    %c0_16 = arith.constant 0 : index
    %c0_17 = arith.constant 0 : index
    %21 = vector.load %arg5[%c0_15, %c1, %c0_16, %c0_17] : memref<1x3x8x128xf32, #tpu.memory_space<vmem>>, vector<1x1x8x128xf32>
    %22 = vector.shape_cast %21 : vector<1x1x8x128xf32> to vector<8x128xf32>
    %23 = vector.shape_cast %11 : vector<16x128xf32> to vector<2x8x128xf32>
    %cst_18 = arith.constant dense<0.000000e+00> : vector<8x128xf32>
    %24 = vector.multi_reduction <add>, %23, %cst_18 [0] : vector<2x8x128xf32> to vector<8x128xf32>
    %25 = arith.addf %22, %24 : vector<8x128xf32>
    %c0_19 = arith.constant 0 : index
    %c1_20 = arith.constant 1 : index
    %c0_21 = arith.constant 0 : index
    %c0_22 = arith.constant 0 : index
    %26 = vector.load %arg5[%c0_19, %c1_20, %c0_21, %c0_22] : memref<1x3x8x128xf32, #tpu.memory_space<vmem>>, vector<1x1x8x128xf32>
    %27 = vector.shape_cast %26 : vector<1x1x8x128xf32> to vector<8x128xf32>
    %28 = vector.shape_cast %25 : vector<8x128xf32> to vector<1x1x8x128xf32>
    tpu.vector_store %arg5[%c0_19, %c1_20, %c0_21, %c0_22], %28 {strides = array<i32>} : memref<1x3x8x128xf32, #tpu.memory_space<vmem>>, vector<1x1x8x128xf32>,
    %c0_23 = arith.constant 0 : index
    %c2 = arith.constant 2 : index
    %c0_24 = arith.constant 0 : index
    %c0_25 = arith.constant 0 : index
    %29 = vector.load %arg5[%c0_23, %c2, %c0_24, %c0_25] : memref<1x3x8x128xf32, #tpu.memory_space<vmem>>, vector<1x1x8x128xf32>
    %30 = vector.shape_cast %29 : vector<1x1x8x128xf32> to vector<8x128xf32>
    %31 = vector.shape_cast %4 : vector<16x128xf32> to vector<2x8x128xf32>
    %cst_26 = arith.constant dense<0.000000e+00> : vector<8x128xf32>
    %32 = vector.multi_reduction <add>, %31, %cst_26 [0] : vector<2x8x128xf32> to vector<8x128xf32>
    %33 = arith.addf %30, %32 : vector<8x128xf32>
    %c0_27 = arith.constant 0 : index
    %c2_28 = arith.constant 2 : index
    %c0_29 = arith.constant 0 : index
    %c0_30 = arith.constant 0 : index
    %34 = vector.load %arg5[%c0_27, %c2_28, %c0_29, %c0_30] : memref<1x3x8x128xf32, #tpu.memory_space<vmem>>, vector<1x1x8x128xf32>
    %35 = vector.shape_cast %34 : vector<1x1x8x128xf32> to vector<8x128xf32>
    %36 = vector.shape_cast %33 : vector<8x128xf32> to vector<1x1x8x128xf32>
    tpu.vector_store %arg5[%c0_27, %c2_28, %c0_29, %c0_30], %36 {strides = array<i32>} : memref<1x3x8x128xf32, #tpu.memory_space<vmem>>, vector<1x1x8x128xf32>,
    return
  }
  func.func @transform_0(%arg0: i32, %arg1: i32, %arg2: memref<1xi32, #tpu.memory_space<smem>>) -> (i32, i32) {
    %c1_i32 = arith.constant 1 : i32
    %0 = arith.muli %arg0, %c1_i32 : i32
    %1 = arith.addi %0, %arg1 : i32
    %c0_i32 = arith.constant 0 : i32
    %2 = arith.minsi %1, %c0_i32 : i32
    %c0_i32_0 = arith.constant 0 : i32
    %c0_i32_1 = arith.constant 0 : i32
    return %2, %c0_i32_0 : i32, i32
  }
  func.func @transform_1(%arg0: i32, %arg1: i32, %arg2: memref<1xi32, #tpu.memory_space<smem>>) -> (i32, i32) {
    %c1_i32 = arith.constant 1 : i32
    %0 = arith.muli %arg0, %c1_i32 : i32
    %1 = arith.addi %0, %arg1 : i32
    %c0_i32 = arith.constant 0 : i32
    %2 = arith.minsi %1, %c0_i32 : i32
    %c0_i32_0 = arith.constant 0 : i32
    %c0_i32_1 = arith.constant 0 : i32
    return %2, %c0_i32_0 : i32, i32
  }
  func.func @transform_2(%arg0: i32, %arg1: i32, %arg2: memref<1xi32, #tpu.memory_space<smem>>) -> (i32, i32, i32, i32) {
    %c0_i32 = arith.constant 0 : i32
    %c0_i32_0 = arith.constant 0 : i32
    %c0_i32_1 = arith.constant 0 : i32
    %c0_i32_2 = arith.constant 0 : i32
    return %arg0, %c0_i32, %c0_i32_0, %c0_i32_1 : i32, i32, i32, i32
  }
}

</mosaic_0001>

<bundles_post_ra>
// kernel: tpu_custom_call.1
= control target key start
LH: loop header
LB: loop body
LE: loop exit
PB: predicated region body
PF: predicated region fallthrough
CT: control target
= control target key end

     0   :  { %9 = vsyncpa [#allocation5], 0  ;;  %s271_s0 = inlined_call_operand.<no memory space> [shape: s32[1], index: 0, kind: input, shape index: {}]   ;;  %s272_s1 = inlined_call_operand.hbm [shape: f32[16,128], index: 1, kind: input, shape index: {}]   ;;  %s273_s2 = inlined_call_operand.hbm [shape: f32[16,128], index: 2, kind: input, shape index: {}]   ;;  %s274_s3 = inlined_call_operand.hbm [shape: f32[1,3,8,128], index: 3, kind: output, shape index: {}]  }
   0x1   :  { %10 = vsyncpa [#allocation8], 0 }
   0x2   :  { %11 = vsyncpa [#allocation6], 0  ;;  %s201_s12 = smov [#allocation4]   ;;  %s129_s16 = scalar_lea.hbm %s272_s1, 256 }
   0x3   :  { %s23_s13 = sshll.u32 %s201_s12, 4  ;;  %p130_p0 = scmp.ne.s32.totalorder %s272_s1, %s129_s16  ;;  %s24_s13 = int_to_ptr.vmem [resolvable:$true] %s23_s13 }
   0x4   :  { %p133_p1 = scmp.lt.u32.totalorder %s129_s16, %s272_s1 }
   0x6   :  { %p135_p2 = pnand %p133_p1, %p130_p0 }
   0x8   :  { %138 = shalt.err (!%p135_p2)
}
   0x9   :  { %s139_s20 = scalar_lea.vmem %s24_s13, 256  ;;  %p144_p4 = scmp.lt.s32.totalorder %s24_s13, %s24_s13 }
   0xa   :  { %p140_p3 = scmp.ne.s32.totalorder %s24_s13, %s139_s20  ;;  %p145_p5 = scmp.lt.s32.totalorder %s139_s20, %s139_s20 }
   0xc   :  { %p146_p6 = por %p145_p5, %p144_p4 }
   0xe   :  { %p147_p7 = pnand %p146_p6, %p140_p3 }
  0x10   :  { %150 = shalt.err (!%p147_p7)
}
  0x11   :  { %s202_s21 = smov 128   ;;  %s203_s22 = smov 8  }
  0x12   :  { %29 = dma.hbm_to_vmem [thread:$0]  %s272_s1, 256, %s24_s13, [#allocation5], %s202_s21, %s202_s21, %s203_s22  }
  0x13   :  { %s204_s25 = smov [#allocation7]   ;;  %s151_s29 = scalar_lea.hbm %s273_s2, 256 }
  0x14   :  { %s41_s26 = sshll.u32 %s204_s25, 4  ;;  %p152_p8 = scmp.ne.s32.totalorder %s273_s2, %s151_s29  ;;  %s42_s26 = int_to_ptr.vmem [resolvable:$true] %s41_s26 }
  0x15   :  { %p155_p9 = scmp.lt.u32.totalorder %s151_s29, %s273_s2 }
  0x17   :  { %p157_p10 = pnand %p155_p9, %p152_p8 }
  0x19   :  { %160 = shalt.err (!%p157_p10)
}
  0x1a   :  { %s161_s7 = scalar_lea.vmem %s42_s26, 256  ;;  %p166_p12 = scmp.lt.s32.totalorder %s42_s26, %s42_s26 }
  0x1b   :  { %p162_p11 = scmp.ne.s32.totalorder %s42_s26, %s161_s7  ;;  %p167_p13 = scmp.lt.s32.totalorder %s161_s7, %s161_s7 }
  0x1d   :  { %p168_p0 = por %p167_p13, %p166_p12 }
  0x1f   :  { %p169_p1 = pnand %p168_p0, %p162_p11 }
  0x21   :  { %172 = shalt.err (!%p169_p1)
}
  0x22   :  { %47 = dma.hbm_to_vmem [thread:$0]  %s273_s2, 256, %s42_s26, [#allocation8], %s202_s21, %s202_s21, %s203_s22  }
  0x23   :  { %195 = dma.done.wait [#allocation5], 256  }
  0x24   :  { %196 = vsyncadd [#allocation5], 4294967040 }
  0x25   :  { %197 = dma.done.wait [#allocation8], 256  }
  0x26   :  { %198 = vsyncadd [#allocation8], 4294967040  ;;  %v69_v0 = vld [vmem:[#allocation4] sm:$0xff]  ;;  %v70_v1 = vld [vmem:[#allocation4 + $0x8] sm:$0xff]  ;;  %s205_s2 = smov [#allocation9]  }
  0x27   :  { %v71_v2 = vld [vmem:[#allocation7] sm:$0xff]  ;;  %v72_v3 = vld [vmem:[#allocation7 + $0x8] sm:$0xff]  ;;  %v73_v4 = vmul.f32 0.5, %v69_v0  ;;  %v74_v5 = vmul.f32 0.5, %v70_v1  ;;  %s102_s9 = sshll.u32 %s205_s2, 4  ;;  %s103_s9 = int_to_ptr.vmem [resolvable:$true] %s102_s9 }
  0x28   :  { %v94_v6 = vadd.f32 %v72_v3, %v71_v2  ;;  %s173_s10 = scalar_lea.vmem %s103_s9, 384  ;;  %p178_p3 = scmp.lt.s32.totalorder %s103_s9, %s103_s9 }
  0x29   :  { %125 = vtanh.f32 %v73_v4  ;;  %p174_p2 = scmp.ne.s32.totalorder %s103_s9, %s173_s10  ;;  %p179_p4 = scmp.lt.s32.totalorder %s173_s10, %s173_s10 }
  0x2a   :  { %127 = vtanh.f32 %v74_v5  ;;  %96 = vst [vmem:[#allocation9 + $0x10] sm:$0xff] %v94_v6 }
  0x2b   :  { %p180_p5 = por %p179_p4, %p178_p3 }
  0x2d   :  { %p181_p6 = pnand %p180_p5, %p174_p2 }
  0x33   :  { %v126_v7 = vpop.eup %125 }
  0x34   :  { %v128_v8 = vpop.eup %127  ;;  %v77_v9 = vmul.f32 0.5, %v126_v7 }
  0x35   :  { %v78_v10 = vmul.f32 0.5, %v128_v8 }
  0x36   :  { %v79_v11 = vadd.f32 0.5, %v77_v9 }
  0x37   :  { %v80_v12 = vadd.f32 0.5, %v78_v10 }
  0x38   :  { %v81_v13 = vmul.f32 %v79_v11, %v71_v2 }
  0x39   :  { %v82_v14 = vmul.f32 %v80_v12, %v72_v3  ;;  %v89_v15 = vadd.f32 %v80_v12, %v79_v11 }
  0x3b   :  { %v84_v16 = vadd.f32 %v82_v14, %v81_v13  ;;  %91 = vst [vmem:[#allocation9 + $0x8] sm:$0xff] %v89_v15 }
  0x3d   :  { %86 = vst [vmem:[#allocation9] sm:$0xff] %v84_v16 }
  0x3e   :  { %184 = shalt.err (!%p181_p6)
}
  0x3f   :  { %s185_s13 = scalar_lea.hbm %s274_s3, 384 }
  0x40   :  { %p186_p7 = scmp.ne.s32.totalorder %s274_s3, %s185_s13  ;;  %p189_p8 = scmp.lt.u32.totalorder %s185_s13, %s274_s3 }
  0x42   :  { %p191_p9 = pnand %p189_p8, %p186_p7 }
  0x44   :  { %194 = shalt.err (!%p191_p9)
}
  0x45   :  { %108 = dma.vmem_to_hbm [thread:$0]  %s103_s9, 384, %s274_s3, [#allocation6], %s202_s21, %s202_s21, %s203_s22  }
  0x46   :  { %199 = dma.done.wait [#allocation6], 384  }
  0x47   :  { %200 = vsyncadd [#allocation6], 4294966912 }
  0x48   :  { %112 = vsyncpa [#allocation5], 1 }
  0x49   :  { %113 = vsyncpa [#allocation8], 1 }
  0x4a   :  { %114 = vsyncpa [#allocation6], 1 }

</bundles_post_ra>
